<compile_context>
chip_gen: v7x
topology: tpu7x:2x2x1
jax: 0.10.0
libtpu: 0.0.40
codegen_flags: <defaults>
</compile_context>

<pallas_src>
import functools

import jax
import jax.numpy as jnp
from jax import lax
from jax.experimental import pallas as pl
from jax.experimental.pallas import tpu as pltpu


# ---------------------------------------------------------------------------
# Kernel 1: style dense  ->  (B, 2C) modulation parameters
# ---------------------------------------------------------------------------
def _style_dense_kernel(s_ref, w_ref, b_ref, o_ref):
    # s_ref: (B, S)   w_ref: (S, 2C)   b_ref: (1, 2C)   o_ref: (B, 2C)
    acc = jnp.dot(s_ref[...], w_ref[...], preferred_element_type=jnp.float32)
    o_ref[...] = (acc + b_ref[...]).astype(o_ref.dtype)


def _style_dense(style, w_t, bias):
    B, _ = style.shape
    N = w_t.shape[1]
    # Tiny op: single invocation, whole arrays resident in VMEM.
    return pl.pallas_call(
        _style_dense_kernel,
        out_shape=jax.ShapeDtypeStruct((B, N), jnp.float32),
    )(style, w_t, bias.reshape(1, N))


# ---------------------------------------------------------------------------
# Kernel 2: fused GroupNorm (affine=False) + adaptive gamma/beta modulation
# ---------------------------------------------------------------------------
def _agn_kernel(x_ref, g_ref, b_ref, o_ref, *, eps):
    # x_ref: (1, Cg, HW)   g_ref, b_ref: (1, Cg, 1)   o_ref: (1, Cg, HW)
    x = x_ref[...].astype(jnp.float32)
    n = x.shape[1] * x.shape[2]
    inv_n = 1.0 / n

    mean = jnp.sum(x) * inv_n                 # two-pass stats in f32
    xc = x - mean
    var = jnp.sum(xc * xc) * inv_n            # biased var (matches nn.GroupNorm)
    inv_std = lax.rsqrt(var + eps)

    gamma = g_ref[...].astype(jnp.float32)    # (1, Cg, 1) -> broadcast over lanes
    beta = b_ref[...].astype(jnp.float32)
    o_ref[...] = (gamma * (xc * inv_std) + beta).astype(o_ref.dtype)


def adaptive_group_norm(x, style, *, num_groups, style_weight, style_bias,
                        eps=1e-6):
    """AdaptiveGroupNorm forward.

    x:            (B, C, H, W)  NCHW, like the PyTorch module
    style:        (B, style_dim)
    style_weight: (2C, style_dim)  torch Linear weight layout
    style_bias:   (2C,)
    """
    B, C, H, W = x.shape
    assert C % num_groups == 0, "channels must divide num_groups"
    Cg = C // num_groups
    HW = H * W
    G = num_groups

    # ---- gamma / beta from the style vector (tiny MXU matmul) --------------
    w_t = jnp.transpose(style_weight).astype(jnp.float32)      # (S, 2C)
    gb = _style_dense(style.astype(jnp.float32), w_t,
                      style_bias.astype(jnp.float32))           # (B, 2C)
    gamma = gb[:, :C].reshape(B * G, Cg, 1)
    beta = gb[:, C:].reshape(B * G, Cg, 1)

    # ---- fused GroupNorm + modulation, one grid step per (batch, group) ----
    xg = x.reshape(B * G, Cg, HW)   # contiguous reshape only, no transpose

    cost = pl.CostEstimate(
        flops=int(10 * B * C * HW),
        transcendentals=int(B * G),
        bytes_accessed=int((2 * B * C * HW + 4 * B * C) * 4),
    )

    out = pl.pallas_call(
        functools.partial(_agn_kernel, eps=eps),
        out_shape=jax.ShapeDtypeStruct((B * G, Cg, HW), x.dtype),
        grid_spec=pltpu.PrefetchScalarGridSpec(
            num_scalar_prefetch=0,
            grid=(B * G,),
            in_specs=[
                pl.BlockSpec((1, Cg, HW), lambda i: (i, 0, 0)),
                pl.BlockSpec((1, Cg, 1), lambda i: (i, 0, 0)),
                pl.BlockSpec((1, Cg, 1), lambda i: (i, 0, 0)),
            ],
            out_specs=pl.BlockSpec((1, Cg, HW), lambda i: (i, 0, 0)),
        ),
        compiler_params=pltpu.CompilerParams(
            # independent (batch, group) slabs -> megacore-shardable on v7x
            dimension_semantics=("parallel",),
        ),
        cost_estimate=cost,
    )(xg, gamma, beta)

    return out.reshape(B, C, H, W)


# ---------------------------------------------------------------------------
# Demo / self-check
# ---------------------------------------------------------------------------
if __name__ == "__main__":
    key = jax.random.PRNGKey(0)
    kx, ks, kw = jax.random.split(key, 3)

    B, C, H, W = 2, 4, 16, 16
    num_groups = 2
    style_dim = 32

    x = jax.random.normal(kx, (B, C, H, W), jnp.float32)
    style = jax.random.normal(ks, (B, style_dim), jnp.float32)

    # Synthetic dense weights; bias initialized as in the module
    # (bias[:C] = 1 -> gamma centered at 1, bias[C:] = 0 -> beta centered at 0).
    style_weight = jax.random.normal(kw, (2 * C, style_dim), jnp.float32) * 0.05
    style_bias = jnp.concatenate(
        [jnp.ones((C,), jnp.float32), jnp.zeros((C,), jnp.float32)])

    y = jax.block_until_ready(adaptive_group_norm(
        x, style, num_groups=num_groups,
        style_weight=style_weight, style_bias=style_bias))

    # ---- pure-JAX reference mirroring the PyTorch forward ------------------
    gb_ref = style @ style_weight.T + style_bias
    gamma_ref = gb_ref[:, :C][:, :, None, None]
    beta_ref = gb_ref[:, C:][:, :, None, None]
    xg = x.reshape(B, num_groups, C // num_groups, H, W)
    mean = xg.mean(axis=(2, 3, 4), keepdims=True)
    var = xg.var(axis=(2, 3, 4), keepdims=True)          # biased, like GroupNorm
    xn = ((xg - mean) / jnp.sqrt(var + 1e-6)).reshape(B, C, H, W)
    ref = gamma_ref * xn + beta_ref

    assert y.shape == (B, C, H, W), y.shape
    max_err = float(jnp.max(jnp.abs(y - ref)))
    assert jnp.allclose(y, ref, atol=1e-4, rtol=1e-4), f"mismatch, max_err={max_err}"

    print("KERNEL_OK")
</pallas_src>

<mosaic_0001>
module attributes {stable_mosaic.version = 11 : i64} {
  func.func @_style_dense_kernel(%arg0: memref<2x32xf32, #tpu.memory_space<vmem>>, %arg1: memref<32x8xf32, #tpu.memory_space<vmem>>, %arg2: memref<1x8xf32, #tpu.memory_space<vmem>>, %arg3: memref<2x8xf32, #tpu.memory_space<vmem>>) attributes {dimension_semantics = [], scalar_prefetch = 0 : i64, scratch_operands = 0 : i64, tpu.core_type = #tpu.core_type<tc>} {
    %c0 = arith.constant 0 : index
    %c0_0 = arith.constant 0 : index
    %0 = vector.load %arg0[%c0, %c0_0] : memref<2x32xf32, #tpu.memory_space<vmem>>, vector<2x32xf32>
    %c0_1 = arith.constant 0 : index
    %c0_2 = arith.constant 0 : index
    %1 = vector.load %arg1[%c0_1, %c0_2] : memref<32x8xf32, #tpu.memory_space<vmem>>, vector<32x8xf32>
    %cst = arith.constant dense<0.000000e+00> : vector<2x8xf32>
    %2 = tpu.matmul %0, %1, %cst {dimension_numbers = #tpu.dot_dimension_numbers<[1], [0], [0], [1], [0, 0, 1, 1], [], []>} : vector<2x32xf32>, vector<32x8xf32>, vector<2x8xf32> -> vector<2x8xf32>
    %c0_3 = arith.constant 0 : index
    %c0_4 = arith.constant 0 : index
    %3 = vector.load %arg2[%c0_3, %c0_4] : memref<1x8xf32, #tpu.memory_space<vmem>>, vector<1x8xf32>
    %4 = vector.broadcast %3 : vector<1x8xf32> to vector<2x8xf32>
    %5 = arith.addf %2, %4 : vector<2x8xf32>
    %c0_5 = arith.constant 0 : index
    %c0_6 = arith.constant 0 : index
    %6 = vector.load %arg3[%c0_5, %c0_6] : memref<2x8xf32, #tpu.memory_space<vmem>>, vector<2x8xf32>
    tpu.vector_store %arg3[%c0_5, %c0_6], %5 {strides = array<i32>} : memref<2x8xf32, #tpu.memory_space<vmem>>, vector<2x8xf32>,
    return
  }
}

</mosaic_0001>

<bundles_post_ra>
// kernel: tpu_custom_call.1
= control target key start
LH: loop header
LB: loop body
LE: loop exit
PB: predicated region body
PF: predicated region fallthrough
CT: control target
= control target key end

     0   :  { %v169_v3 = vmov 0.0|0.0   ;;  %vm170_vm0 = vmmov 0   ;;  %v171_v6 = vmov 0.0   ;;  %s223_s0 = inlined_call_operand.vmem [shape: f32[2,32], index: 0, kind: input, shape index: {}]   ;;  %s224_s1 = inlined_call_operand.vmem [shape: f32[32,8], index: 1, kind: input, shape index: {}]   ;;  %s225_s2 = inlined_call_operand.vmem [shape: f32[1,8], index: 2, kind: input, shape index: {}]   ;;  %s226_s3 = inlined_call_operand.hbm [shape: f32[2,8], index: 3, kind: output, shape index: {}]  }
   0x1   :  { %v16_v0 = vld [vmem:[%s224_s1] sm:$0xff]  ;;  %v17_v1 = vld [vmem:[%s224_s1 + $0x8] sm:$0xff]  ;;  %v18_v2 = vld [vmem:[%s224_s1 + $0x10] sm:$0xff]  ;;  %135 = vmatprep.subr.bf16.mxu0 %v169_v3  ;;  %132 = vmatprep.mubr.msk.f32.mxu0 %vm170_vm0, %v171_v6 }
   0x2   :  { %v136_v4 = vpack.c.bf16 %v17_v1, %v16_v0  ;;  %v19_v5 = vld [vmem:[%s224_s1 + $0x18] sm:$0xff] }
   0x3   :  { %8 = vsyncpa [#allocation3], 0  ;;  %v139_v7 = vpack.c.bf16 %v19_v5, %v18_v2  ;;  %v15_v8 = vld [vmem:[%s223_s0] sm:$0x3]  ;;  %vm27_vm1 = vcmask 261120   ;;  %s172_s24 = smov [#allocation2]  }
   0x4   :  { %137 = vmatpush3.bf16.msra.mxu0 %v136_v4  ;;  %v117_v9 = vld [vmem:[%s225_s2] ss:$0 sm:$0xff]  ;;  %s109_s1 = sshll.u32 %s172_s24, 4  ;;  %vm101_vm2 = vcmask 58368   ;;  %s110_s1 = int_to_ptr.vmem [resolvable:$true] %s109_s1 }
   0x5   :  { %138 = vmatprep.subr.bf16.mxu0 %v169_v3  ;;  %s145_s25 = scalar_lea.vmem %s110_s1, 32  ;;  %p150_p1 = scmp.lt.s32.totalorder %s110_s1, %s110_s1 }
   0x6   :  { %p146_p0 = scmp.ne.s32.totalorder %s110_s1, %s145_s25  ;;  %p151_p2 = scmp.lt.s32.totalorder %s145_s25, %s145_s25 }
   0x8   :  { %140 = vmatpush3.bf16.msra.mxu0 %v139_v7  ;;  %p152_p3 = por %p151_p2, %p150_p1 }
   0xa   :  { %p153_p4 = pnand %p152_p3, %p146_p0 }
   0xb   :  { %133 = vmatmul.mubr.msk.f32.vlgmr.msra.gmra.mrb[0].mxu0 %vm27_vm1, %v15_v8 }
  0xde   :  { %v97_v10 = vpop.f32.mrb[0].mxu0 }
  0xdf   :  { %v98_v11 = vadd.f32 %v117_v9, %v97_v10  ;;  %v134_v12 = vpop.f32.mrb[1].mxu0 }
  0xe1   :  { %102 = vst.msk [vmem:[#allocation2] sm:$0x3] %vm101_vm2, %v98_v11 }
  0xe2   :  { %156 = shalt.err (!%p153_p4)
}
  0xe3   :  { %s157_s27 = scalar_lea.hbm %s226_s3, 32 }
  0xe4   :  { %p158_p5 = scmp.ne.s32.totalorder %s226_s3, %s157_s27  ;;  %p161_p6 = scmp.lt.u32.totalorder %s157_s27, %s226_s3 }
  0xe6   :  { %p163_p7 = pnand %p161_p6, %p158_p5 }
  0xe8   :  { %166 = shalt.err (!%p163_p7)
}
  0xe9   :  { %112 = dma.vmem_to_hbm [thread:$0]  %s110_s1, 32, %s226_s3, [#allocation3]  }
  0xea   :  { %167 = dma.done.wait [#allocation3], 32  }
  0xeb   :  { %168 = vsyncadd [#allocation3], 4294967264 }
  0xec   :  { %116 = vsyncpa [#allocation3], 1 }

</bundles_post_ra>
